<compile_context>
chip_gen: v7x
topology: tpu7x:2x2x1
jax: 0.10.0
libtpu: 0.0.40
codegen_flags: <defaults>
</compile_context>

<pallas_src>
import jax
import jax.numpy as jnp
from jax.experimental import pallas as pl
from jax.experimental.pallas import tpu as pltpu

HIDDEN = 256
LANE = 128
DEFAULT_TB = 512  # batch tile; multiple of 256 (v6e/v7x MXU) and 128 (v5e MXU)


def _round_up(x, m):
    return ((x + m - 1) // m) * m


def actor_kernel(ma_ref,
                 x_ref,
                 w1_ref, b1_ref,
                 w2_ref, b2_ref,
                 w3_ref, b3_ref,
                 w4_ref, b4_ref,
                 o_ref):
    """Fused 4-layer MLP on one (TB, *) batch tile. Weights are bf16, acc is f32."""
    max_action = ma_ref[0]  # SMEM scalar

    h = jnp.dot(x_ref[...].astype(jnp.bfloat16), w1_ref[...],
                preferred_element_type=jnp.float32) + b1_ref[...]
    h = jnp.maximum(h, 0.0)
    h = jnp.dot(h.astype(jnp.bfloat16), w2_ref[...],
                preferred_element_type=jnp.float32) + b2_ref[...]
    h = jnp.maximum(h, 0.0)
    h = jnp.dot(h.astype(jnp.bfloat16), w3_ref[...],
                preferred_element_type=jnp.float32) + b3_ref[...]
    h = jnp.maximum(h, 0.0)
    h = jnp.dot(h.astype(jnp.bfloat16), w4_ref[...],
                preferred_element_type=jnp.float32) + b4_ref[...]
    o_ref[...] = (max_action * jnp.tanh(h)).astype(o_ref.dtype)


def actor_forward(state, params, max_action, *, block_b=DEFAULT_TB):
    """state: (B, state_dim) float32; params: dict of (in,out) weights and (1,out) biases."""
    B, state_dim = state.shape
    action_dim = params["w4"].shape[1]

    # Batch tile: multiple of 128 (MXU M granularity on all chips), capped at block_b.
    tb = min(block_b, _round_up(B, LANE))
    b_pad = _round_up(B, tb)
    out_pad = _round_up(action_dim, LANE)  # lane-dense output store

    # Pad batch so the grid tiles evenly; pad final layer to a 128-lane output.
    x = state if b_pad == B else jnp.pad(state, ((0, b_pad - B), (0, 0)))
    w4 = jnp.pad(params["w4"], ((0, 0), (0, out_pad - action_dim)))
    b4 = jnp.pad(params["b4"], ((0, 0), (0, out_pad - action_dim)))

    # bf16 MXU operands (weights); biases stay f32 for the VPU epilogue.
    w1 = params["w1"].astype(jnp.bfloat16)
    w2 = params["w2"].astype(jnp.bfloat16)
    w3 = params["w3"].astype(jnp.bfloat16)
    w4 = w4.astype(jnp.bfloat16)

    const = lambda i, ma: (0, 0)  # weights/biases: same block every grid step (resident)
    grid = (b_pad // tb,)

    out_padded = pl.pallas_call(
        actor_kernel,
        out_shape=jax.ShapeDtypeStruct((b_pad, out_pad), jnp.float32),
        grid_spec=pltpu.PrefetchScalarGridSpec(
            num_scalar_prefetch=1,  # max_action -> SMEM, no recompile per value
            grid=grid,
            in_specs=[
                pl.BlockSpec((tb, state_dim), lambda i, ma: (i, 0)),   # state tile
                pl.BlockSpec((state_dim, HIDDEN), const),              # w1
                pl.BlockSpec((1, HIDDEN), const),                      # b1
                pl.BlockSpec((HIDDEN, HIDDEN), const),                 # w2
                pl.BlockSpec((1, HIDDEN), const),                      # b2
                pl.BlockSpec((HIDDEN, HIDDEN), const),                 # w3
                pl.BlockSpec((1, HIDDEN), const),                      # b3
                pl.BlockSpec((HIDDEN, out_pad), const),                # w4 (padded)
                pl.BlockSpec((1, out_pad), const),                     # b4 (padded)
            ],
            out_specs=pl.BlockSpec((tb, out_pad), lambda i, ma: (i, 0)),
        ),
        compiler_params=pltpu.CompilerParams(
            dimension_semantics=("parallel",),  # shard batch tiles across TCs (v7x)
        ),
    )(jnp.asarray([max_action], jnp.float32),
      x,
      w1, params["b1"],
      w2, params["b2"],
      w3, params["b3"],
      w4, b4)

    return out_padded[:B, :action_dim]


def init_params(key, state_dim, action_dim):
    ks = jax.random.split(key, 8)

    def lin(kw, kb, fan_in, fan_out):
        bound = 1.0 / jnp.sqrt(fan_in)
        w = jax.random.uniform(kw, (fan_in, fan_out), jnp.float32, -bound, bound)
        b = jax.random.uniform(kb, (1, fan_out), jnp.float32, -bound, bound)
        return w, b

    w1, b1 = lin(ks[0], ks[1], state_dim, HIDDEN)
    w2, b2 = lin(ks[2], ks[3], HIDDEN, HIDDEN)
    w3, b3 = lin(ks[4], ks[5], HIDDEN, HIDDEN)
    w4, b4 = lin(ks[6], ks[7], HIDDEN, action_dim)
    return dict(w1=w1, b1=b1, w2=w2, b2=b2, w3=w3, b3=b3, w4=w4, b4=b4)


def actor_forward_ref(state, params, max_action):
    """Pure-JAX reference mimicking the kernel's bf16 MXU operands / f32 accumulation."""
    def layer(x, w, b):
        return jnp.dot(x.astype(jnp.bfloat16), w.astype(jnp.bfloat16),
                       preferred_element_type=jnp.float32) + b
    h = jnp.maximum(layer(state, params["w1"], params["b1"]), 0.0)
    h = jnp.maximum(layer(h, params["w2"], params["b2"]), 0.0)
    h = jnp.maximum(layer(h, params["w3"], params["b3"]), 0.0)
    return max_action * jnp.tanh(layer(h, params["w4"], params["b4"]))


if __name__ == "__main__":
    key = jax.random.PRNGKey(0)
    k_param, k_state = jax.random.split(key)

    batch = 2
    state_dim = 16
    action_dim = 4
    max_action = 1.5

    params = init_params(k_param, state_dim, action_dim)
    state = jax.random.normal(k_state, (batch, state_dim), jnp.float32)

    out = actor_forward(state, params, max_action)
    out = jax.block_until_ready(out)

    ref = actor_forward_ref(state, params, max_action)
    assert out.shape == (batch, action_dim)
    assert jnp.allclose(out, ref, atol=2e-2, rtol=2e-2), "mismatch vs JAX reference"
    print("KERNEL_OK")
</pallas_src>

<mosaic_0001>
module attributes {stable_mosaic.version = 11 : i64} {
  func.func @actor_kernel(%arg0: i32, %arg1: memref<1xf32, #tpu.memory_space<smem>>, %arg2: memref<128x16xf32, #tpu.memory_space<vmem>>, %arg3: memref<16x256xbf16, #tpu.memory_space<vmem>>, %arg4: memref<1x256xf32, #tpu.memory_space<vmem>>, %arg5: memref<256x256xbf16, #tpu.memory_space<vmem>>, %arg6: memref<1x256xf32, #tpu.memory_space<vmem>>, %arg7: memref<256x256xbf16, #tpu.memory_space<vmem>>, %arg8: memref<1x256xf32, #tpu.memory_space<vmem>>, %arg9: memref<256x128xbf16, #tpu.memory_space<vmem>>, %arg10: memref<1x128xf32, #tpu.memory_space<vmem>>, %arg11: memref<128x128xf32, #tpu.memory_space<vmem>>) attributes {dimension_semantics = [#tpu.dimension_semantics<parallel>], iteration_bounds = array<i64: 1>, scalar_prefetch = 1 : i64, scratch_operands = 0 : i64, tpu.core_type = #tpu.core_type<tc>, window_params = [{transform_indices = @transform_0, window_bounds = array<i64: 128, 16>}, {pipeline_mode = #tpu.pipeline_mode<synchronous>, transform_indices = @transform_1, window_bounds = array<i64: 16, 256>}, {pipeline_mode = #tpu.pipeline_mode<synchronous>, transform_indices = @transform_2, window_bounds = array<i64: 1, 256>}, {pipeline_mode = #tpu.pipeline_mode<synchronous>, transform_indices = @transform_3, window_bounds = array<i64: 256, 256>}, {pipeline_mode = #tpu.pipeline_mode<synchronous>, transform_indices = @transform_4, window_bounds = array<i64: 1, 256>}, {pipeline_mode = #tpu.pipeline_mode<synchronous>, transform_indices = @transform_5, window_bounds = array<i64: 256, 256>}, {pipeline_mode = #tpu.pipeline_mode<synchronous>, transform_indices = @transform_6, window_bounds = array<i64: 1, 256>}, {pipeline_mode = #tpu.pipeline_mode<synchronous>, transform_indices = @transform_7, window_bounds = array<i64: 256, 128>}, {pipeline_mode = #tpu.pipeline_mode<synchronous>, transform_indices = @transform_8, window_bounds = array<i64: 1, 128>}, {transform_indices = @transform_9, window_bounds = array<i64: 128, 128>}]} {
    %c0 = arith.constant 0 : index
    %0 = memref.load %arg1[%c0] : memref<1xf32, #tpu.memory_space<smem>>
    %c0_0 = arith.constant 0 : index
    %c0_1 = arith.constant 0 : index
    %1 = vector.load %arg2[%c0_0, %c0_1] : memref<128x16xf32, #tpu.memory_space<vmem>>, vector<128x16xf32>
    %2 = arith.truncf %1 : vector<128x16xf32> to vector<128x16xbf16>
    %c0_2 = arith.constant 0 : index
    %c0_3 = arith.constant 0 : index
    %3 = vector.load %arg3[%c0_2, %c0_3] : memref<16x256xbf16, #tpu.memory_space<vmem>>, vector<16x256xbf16>
    %cst = arith.constant dense<0.000000e+00> : vector<128x256xf32>
    %4 = tpu.matmul %2, %3, %cst {dimension_numbers = #tpu.dot_dimension_numbers<[1], [0], [0], [1], [0, 0, 1, 1], [], []>} : vector<128x16xbf16>, vector<16x256xbf16>, vector<128x256xf32> -> vector<128x256xf32>
    %c0_4 = arith.constant 0 : index
    %c0_5 = arith.constant 0 : index
    %5 = vector.load %arg4[%c0_4, %c0_5] : memref<1x256xf32, #tpu.memory_space<vmem>>, vector<1x256xf32>
    %6 = vector.broadcast %5 : vector<1x256xf32> to vector<128x256xf32>
    %7 = arith.addf %4, %6 : vector<128x256xf32>
    %cst_6 = arith.constant 0.000000e+00 : f32
    %8 = vector.broadcast %cst_6 : f32 to vector<128x256xf32>
    %9 = arith.maximumf %7, %8 : vector<128x256xf32>
    %10 = arith.truncf %9 : vector<128x256xf32> to vector<128x256xbf16>
    %c0_7 = arith.constant 0 : index
    %c0_8 = arith.constant 0 : index
    %11 = vector.load %arg5[%c0_7, %c0_8] : memref<256x256xbf16, #tpu.memory_space<vmem>>, vector<256x256xbf16>
    %cst_9 = arith.constant dense<0.000000e+00> : vector<128x256xf32>
    %12 = tpu.matmul %10, %11, %cst_9 {dimension_numbers = #tpu.dot_dimension_numbers<[1], [0], [0], [1], [0, 0, 1, 1], [], []>} : vector<128x256xbf16>, vector<256x256xbf16>, vector<128x256xf32> -> vector<128x256xf32>
    %c0_10 = arith.constant 0 : index
    %c0_11 = arith.constant 0 : index
    %13 = vector.load %arg6[%c0_10, %c0_11] : memref<1x256xf32, #tpu.memory_space<vmem>>, vector<1x256xf32>
    %14 = vector.broadcast %13 : vector<1x256xf32> to vector<128x256xf32>
    %15 = arith.addf %12, %14 : vector<128x256xf32>
    %cst_12 = arith.constant 0.000000e+00 : f32
    %16 = vector.broadcast %cst_12 : f32 to vector<128x256xf32>
    %17 = arith.maximumf %15, %16 : vector<128x256xf32>
    %18 = arith.truncf %17 : vector<128x256xf32> to vector<128x256xbf16>
    %c0_13 = arith.constant 0 : index
    %c0_14 = arith.constant 0 : index
    %19 = vector.load %arg7[%c0_13, %c0_14] : memref<256x256xbf16, #tpu.memory_space<vmem>>, vector<256x256xbf16>
    %cst_15 = arith.constant dense<0.000000e+00> : vector<128x256xf32>
    %20 = tpu.matmul %18, %19, %cst_15 {dimension_numbers = #tpu.dot_dimension_numbers<[1], [0], [0], [1], [0, 0, 1, 1], [], []>} : vector<128x256xbf16>, vector<256x256xbf16>, vector<128x256xf32> -> vector<128x256xf32>
    %c0_16 = arith.constant 0 : index
    %c0_17 = arith.constant 0 : index
    %21 = vector.load %arg8[%c0_16, %c0_17] : memref<1x256xf32, #tpu.memory_space<vmem>>, vector<1x256xf32>
    %22 = vector.broadcast %21 : vector<1x256xf32> to vector<128x256xf32>
    %23 = arith.addf %20, %22 : vector<128x256xf32>
    %cst_18 = arith.constant 0.000000e+00 : f32
    %24 = vector.broadcast %cst_18 : f32 to vector<128x256xf32>
    %25 = arith.maximumf %23, %24 : vector<128x256xf32>
    %26 = arith.truncf %25 : vector<128x256xf32> to vector<128x256xbf16>
    %c0_19 = arith.constant 0 : index
    %c0_20 = arith.constant 0 : index
    %27 = vector.load %arg9[%c0_19, %c0_20] : memref<256x128xbf16, #tpu.memory_space<vmem>>, vector<256x128xbf16>
    %cst_21 = arith.constant dense<0.000000e+00> : vector<128x128xf32>
    %28 = tpu.matmul %26, %27, %cst_21 {dimension_numbers = #tpu.dot_dimension_numbers<[1], [0], [0], [1], [0, 0, 1, 1], [], []>} : vector<128x256xbf16>, vector<256x128xbf16>, vector<128x128xf32> -> vector<128x128xf32>
    %c0_22 = arith.constant 0 : index
    %c0_23 = arith.constant 0 : index
    %29 = vector.load %arg10[%c0_22, %c0_23] : memref<1x128xf32, #tpu.memory_space<vmem>>, vector<1x128xf32>
    %30 = vector.broadcast %29 : vector<1x128xf32> to vector<128x128xf32>
    %31 = arith.addf %28, %30 : vector<128x128xf32>
    %32 = math.tanh %31 : vector<128x128xf32>
    %33 = vector.broadcast %0 : f32 to vector<128x128xf32>
    %34 = arith.mulf %33, %32 : vector<128x128xf32>
    %c0_24 = arith.constant 0 : index
    %c0_25 = arith.constant 0 : index
    %35 = vector.load %arg11[%c0_24, %c0_25] : memref<128x128xf32, #tpu.memory_space<vmem>>, vector<128x128xf32>
    tpu.vector_store %arg11[%c0_24, %c0_25], %34 {strides = array<i32>} : memref<128x128xf32, #tpu.memory_space<vmem>>, vector<128x128xf32>,
    return
  }
  func.func @transform_0(%arg0: i32, %arg1: memref<1xf32, #tpu.memory_space<smem>>) -> (i32, i32) {
    %c0_i32 = arith.constant 0 : i32
    %c0_i32_0 = arith.constant 0 : i32
    return %arg0, %c0_i32 : i32, i32
  }
  func.func @transform_1(%arg0: i32, %arg1: memref<1xf32, #tpu.memory_space<smem>>) -> (i32, i32) {
    %c0_i32 = arith.constant 0 : i32
    %c0_i32_0 = arith.constant 0 : i32
    %c0_i32_1 = arith.constant 0 : i32
    return %c0_i32, %c0_i32_0 : i32, i32
  }
  func.func @transform_2(%arg0: i32, %arg1: memref<1xf32, #tpu.memory_space<smem>>) -> (i32, i32) {
    %c0_i32 = arith.constant 0 : i32
    %c0_i32_0 = arith.constant 0 : i32
    %c0_i32_1 = arith.constant 0 : i32
    return %c0_i32, %c0_i32_0 : i32, i32
  }
  func.func @transform_3(%arg0: i32, %arg1: memref<1xf32, #tpu.memory_space<smem>>) -> (i32, i32) {
    %c0_i32 = arith.constant 0 : i32
    %c0_i32_0 = arith.constant 0 : i32
    %c0_i32_1 = arith.constant 0 : i32
    return %c0_i32, %c0_i32_0 : i32, i32
  }
  func.func @transform_4(%arg0: i32, %arg1: memref<1xf32, #tpu.memory_space<smem>>) -> (i32, i32) {
    %c0_i32 = arith.constant 0 : i32
    %c0_i32_0 = arith.constant 0 : i32
    %c0_i32_1 = arith.constant 0 : i32
    return %c0_i32, %c0_i32_0 : i32, i32
  }
  func.func @transform_5(%arg0: i32, %arg1: memref<1xf32, #tpu.memory_space<smem>>) -> (i32, i32) {
    %c0_i32 = arith.constant 0 : i32
    %c0_i32_0 = arith.constant 0 : i32
    %c0_i32_1 = arith.constant 0 : i32
    return %c0_i32, %c0_i32_0 : i32, i32
  }
  func.func @transform_6(%arg0: i32, %arg1: memref<1xf32, #tpu.memory_space<smem>>) -> (i32, i32) {
    %c0_i32 = arith.constant 0 : i32
    %c0_i32_0 = arith.constant 0 : i32
    %c0_i32_1 = arith.constant 0 : i32
    return %c0_i32, %c0_i32_0 : i32, i32
  }
  func.func @transform_7(%arg0: i32, %arg1: memref<1xf32, #tpu.memory_space<smem>>) -> (i32, i32) {
    %c0_i32 = arith.constant 0 : i32
    %c0_i32_0 = arith.constant 0 : i32
    %c0_i32_1 = arith.constant 0 : i32
    return %c0_i32, %c0_i32_0 : i32, i32
  }
  func.func @transform_8(%arg0: i32, %arg1: memref<1xf32, #tpu.memory_space<smem>>) -> (i32, i32) {
    %c0_i32 = arith.constant 0 : i32
    %c0_i32_0 = arith.constant 0 : i32
    %c0_i32_1 = arith.constant 0 : i32
    return %c0_i32, %c0_i32_0 : i32, i32
  }
  func.func @transform_9(%arg0: i32, %arg1: memref<1xf32, #tpu.memory_space<smem>>) -> (i32, i32) {
    %c0_i32 = arith.constant 0 : i32
    %c0_i32_0 = arith.constant 0 : i32
    return %arg0, %c0_i32 : i32, i32
  }
}

</mosaic_0001>

<bundles_post_ra>
// kernel: tpu_custom_call.1
= control target key start
LH: loop header
LB: loop body
LE: loop exit
PB: predicated region body
PF: predicated region fallthrough
CT: control target
= control target key end

     0   :  { %16 = vsyncpa [#allocation5], 0  ;;  %s2133_s0 = inlined_call_operand.<no memory space> [shape: f32[1], index: 0, kind: input, shape index: {}]   ;;  %s2134_s1 = inlined_call_operand.vmem [shape: f32[128,16], index: 1, kind: input, shape index: {}]   ;;  %s2135_s2 = inlined_call_operand.vmem [shape: bf16[16,256], index: 2, kind: input, shape index: {}]   ;;  %s2136_s3 = inlined_call_operand.vmem [shape: f32[1,256], index: 3, kind: input, shape index: {}]   ;;  %s2137_s4 = inlined_call_operand.hbm [shape: bf16[256,256], index: 4, kind: input, shape index: {}]   ;;  %s2138_s5 = inlined_call_operand.vmem [shape: f32[1,256], index: 5, kind: input, shape index: {}]   ;;  %s2139_s6 = inlined_call_operand.hbm [shape: bf16[256,256], index: 6, kind: input, shape index: {}]   ;;  %s2140_s7 = inlined_call_operand.vmem [shape: f32[1,256], index: 7, kind: input, shape index: {}]   ;;  %s2141_s8 = inlined_call_operand.vmem [shape: bf16[256,128], index: 8, kind: input, shape index: {}]   ;;  %s2142_s9 = inlined_call_operand.vmem [shape: f32[1,128], index: 9, kind: input, shape index: {}]   ;;  %s2143_s10 = inlined_call_operand.hbm [shape: f32[128,128], index: 10, kind: output, shape index: {}]  }
   0x1   :  { %17 = vsyncpa [#allocation8], 0 }
   0x2   :  { %18 = vsyncpa [#allocation6], 0  ;;  %s1724_s13 = smov [#allocation4]   ;;  %s1652_s17 = scalar_lea.hbm %s2137_s4, 4096 }
   0x3   :  { %s30_s14 = sshll.u32 %s1724_s13, 4  ;;  %p1653_p0 = scmp.ne.s32.totalorder %s2137_s4, %s1652_s17  ;;  %s31_s14 = int_to_ptr.vmem [resolvable:$true] %s30_s14 }
   0x4   :  { %p1656_p1 = scmp.lt.u32.totalorder %s1652_s17, %s2137_s4 }
   0x6   :  { %p1658_p2 = pnand %p1656_p1, %p1653_p0 }
   0x8   :  { %1661 = shalt.err (!%p1658_p2)
}
   0x9   :  { %s1662_s22 = scalar_lea.vmem %s31_s14, 4096  ;;  %p1667_p4 = scmp.lt.s32.totalorder %s31_s14, %s31_s14 }
   0xa   :  { %p1663_p3 = scmp.ne.s32.totalorder %s31_s14, %s1662_s22  ;;  %p1668_p5 = scmp.lt.s32.totalorder %s1662_s22, %s1662_s22 }
   0xc   :  { %p1669_p6 = por %p1668_p5, %p1667_p4 }
   0xe   :  { %p1670_p7 = pnand %p1669_p6, %p1663_p3 }
  0x10   :  { %1673 = shalt.err (!%p1670_p7)
}
  0x11   :  { %s1725_s23 = smov 128   ;;  %s1726_s24 = smov 8  }
  0x12   :  { %36 = dma.hbm_to_vmem [thread:$0]  %s2137_s4, 4096, %s31_s14, [#allocation5], %s1725_s23, %s1725_s23, %s1726_s24  }
  0x13   :  { %s1727_s27 = smov [#allocation7]   ;;  %s1674_s11 = scalar_lea.hbm %s2139_s6, 4096 }
  0x14   :  { %s44_s28 = sshll.u32 %s1727_s27, 4  ;;  %p1675_p8 = scmp.ne.s32.totalorder %s2139_s6, %s1674_s11  ;;  %s45_s28 = int_to_ptr.vmem [resolvable:$true] %s44_s28 }
  0x15   :  { %p1678_p9 = scmp.lt.u32.totalorder %s1674_s11, %s2139_s6 }
  0x17   :  { %p1680_p10 = pnand %p1678_p9, %p1675_p8 }
  0x19   :  { %1683 = shalt.err (!%p1680_p10)
}
  0x1a   :  { %s1684_s17 = scalar_lea.vmem %s45_s28, 4096  ;;  %p1689_p12 = scmp.lt.s32.totalorder %s45_s28, %s45_s28 }
  0x1b   :  { %p1685_p11 = scmp.ne.s32.totalorder %s45_s28, %s1684_s17  ;;  %p1690_p13 = scmp.lt.s32.totalorder %s1684_s17, %s1684_s17 }
  0x1d   :  { %p1691_p0 = por %p1690_p13, %p1689_p12 }
  0x1f   :  { %p1692_p1 = pnand %p1691_p0, %p1685_p11 }
  0x21   :  { %1695 = shalt.err (!%p1692_p1)
}
  0x22   :  { %50 = dma.hbm_to_vmem [thread:$0]  %s2139_s6, 4096, %s45_s28, [#allocation8], %s1725_s23, %s1725_s23, %s1726_s24  }
  0x23   :  { %1718 = dma.done.wait [#allocation5], 4096  }
  0x24   :  { %1719 = vsyncadd [#allocation5], 4294963200 }
  0x25   :  { %1720 = dma.done.wait [#allocation8], 4096  }
  0x26   :  { %1721 = vsyncadd [#allocation8], 4294963200  ;;  %v1728_v0 = vmov 0   ;;  %v1505_v1 = vld [vmem:[%s2135_s2 + $0x4] ss:$8 sps:$4 sm:$0xff]   ;;  %vm113_vm0 = vcmask 130048  }
  0x27   :  { %170 = vmatprep.mubr.bf16.mxu0 %v1728_v0  ;;  %v1507_v2 = vld [vmem:[%s2135_s2] ss:$8 sps:$4 sm:$0xff]   ;;  %138 = vmatprep.subr.bf16.mxu0 %v1505_v1  ;;  %v67_v6 = vld [vmem:[%s2134_s1 + $0x10] sm:$0xff]  ;;  %v68_v7 = vld [vmem:[%s2134_s1 + $0x18] sm:$0xff] }
  0x28   :  { %v65_v3 = vld [vmem:[%s2134_s1] sm:$0xff]  ;;  %v66_v4 = vld [vmem:[%s2134_s1 + $0x8] sm:$0xff]  ;;  %139 = vmatpush1.bf16.msra.mxu0 %v1507_v2  ;;  %v1511_v10 = vld [vmem:[#allocation4 + $0x14] ss:$8 sps:$4 sm:$0xff]   ;;  %v82_v11 = vpack.c.bf16 %v68_v7, %v67_v6 }
  0x29   :  { %v81_v5 = vpack.c.bf16 %v66_v4, %v65_v3  ;;  %v1508_v8 = vld [vmem:[#allocation4 + $0x4] ss:$8 sps:$4 sm:$0xff]   ;;  %v1510_v9 = vld [vmem:[#allocation4] ss:$8 sps:$4 sm:$0xff]   ;;  %v1513_v12 = vld [vmem:[#allocation4 + $0x10] ss:$8 sps:$4 sm:$0xff]  }
  0x2a   :  { %503 = vmatprep.subr.bf16.mxu1 %v1508_v8  ;;  %v1514_v13 = vld [vmem:[#allocation4 + $0x24] ss:$8 sps:$4 sm:$0xff]   ;;  %v1516_v15 = vld [vmem:[#allocation4 + $0x20] ss:$8 sps:$4 sm:$0xff]   ;;  %v1517_v17 = vld [vmem:[#allocation4 + $0x34] ss:$8 sps:$4 sm:$0xff]  }
  0x2b   :  { %1330 = vmatmul.mubr.msk.bf16.vlgmr.msra.gmra.mrb[0].mxu0 %vm113_vm0, %v81_v5  ;;  %504 = vmatpush1.bf16.msra.mxu1 %v1510_v9  ;;  %v69_v14 = vld [vmem:[%s2134_s1 + $0x20] sm:$0xff]  ;;  %v70_v16 = vld [vmem:[%s2134_s1 + $0x28] sm:$0xff]  ;;  %v1519_v19 = vld [vmem:[#allocation4 + $0x30] ss:$8 sps:$4 sm:$0xff]  }
  0x2c   :  { %180 = vmatprep.mubr.bf16.mxu0 %v1728_v0  ;;  %505 = vmatprep.subr.bf16.mxu1 %v1511_v10  ;;  %v83_v18 = vpack.c.bf16 %v70_v16, %v69_v14  ;;  %v1520_v20 = vld [vmem:[#allocation4 + $0x44] ss:$8 sps:$4 sm:$0xff]   ;;  %v71_v21 = vld [vmem:[%s2134_s1 + $0x30] sm:$0xff]  ;;  %v1522_v22 = vld [vmem:[#allocation4 + $0x40] ss:$8 sps:$4 sm:$0xff]  }
  0x2d   :  { %v72_v23 = vld [vmem:[%s2134_s1 + $0x38] sm:$0xff]  ;;  %v1526_v26 = vld [vmem:[#allocation4 + $0x64] ss:$8 sps:$4 sm:$0xff]   ;;  %v1528_v28 = vld [vmem:[#allocation4 + $0x60] ss:$8 sps:$4 sm:$0xff]  }
  0x2e   :  { %v1523_v24 = vld [vmem:[#allocation4 + $0x54] ss:$8 sps:$4 sm:$0xff]   ;;  %v1525_v25 = vld [vmem:[#allocation4 + $0x50] ss:$8 sps:$4 sm:$0xff]   ;;  %v84_v27 = vpack.c.bf16 %v72_v23, %v71_v21  ;;  %v73_v29 = vld [vmem:[%s2134_s1 + $0x40] sm:$0xff] }
  0x2f   :  { %506 = vmatpush1.bf16.msra.mxu1 %v1513_v12  ;;  %v74_v30 = vld [vmem:[%s2134_s1 + $0x48] sm:$0xff]  ;;  %v1529_v31 = vld [vmem:[#allocation4 + $0x74] ss:$8 sps:$4 sm:$0xff]   ;;  %v1531_v32 = vld [vmem:[#allocation4 + $0x70] ss:$8 sps:$4 sm:$0xff]  }
  0x30   :  { %507 = vmatprep.subr.bf16.mxu1 %v1514_v13  ;;  %v1532_v33 = vld [vmem:[#allocation4 + $0x84] ss:$8 sps:$4 sm:$0xff]   ;;  %v85_v34 = vpack.c.bf16 %v74_v30, %v73_v29  ;;  %v1534_v35 = vld [vmem:[#allocation4 + $0x80] ss:$8 sps:$4 sm:$0xff]   ;;  %v75_v36 = vld [vmem:[%s2134_s1 + $0x50] sm:$0xff] }
  0x31   :  { %v76_v37 = vld [vmem:[%s2134_s1 + $0x58] sm:$0xff]  ;;  %v1538_v40 = vld [vmem:[#allocation4 + $0xa4] ss:$8 sps:$4 sm:$0xff]   ;;  %v1540_v42 = vld [vmem:[#allocation4 + $0xa0] ss:$8 sps:$4 sm:$0xff]  }
  0x32   :  { %v1535_v38 = vld [vmem:[#allocation4 + $0x94] ss:$8 sps:$4 sm:$0xff]   ;;  %v1537_v39 = vld [vmem:[#allocation4 + $0x90] ss:$8 sps:$4 sm:$0xff]   ;;  %v86_v41 = vpack.c.bf16 %v76_v37, %v75_v36  ;;  %v77_v43 = vld [vmem:[%s2134_s1 + $0x60] sm:$0xff] }
  0x33   :  { %1331 = vmatmul.mubr.msk.bf16.gmra.mrb[4].mxu0 %vm113_vm0, %v82_v11  ;;  %508 = vmatpush1.bf16.msra.mxu1 %v1516_v15  ;;  %v78_v44 = vld [vmem:[%s2134_s1 + $0x68] sm:$0xff]  ;;  %v1541_v45 = vld [vmem:[#allocation4 + $0xb4] ss:$8 sps:$4 sm:$0xff]   ;;  %v1543_v47 = vld [vmem:[#allocation4 + $0xb0] ss:$8 sps:$4 sm:$0xff]  }
  0x34   :  { %190 = vmatprep.mubr.bf16.mxu0 %v1728_v0  ;;  %509 = vmatprep.subr.bf16.mxu1 %v1517_v17  ;;  %v87_v46 = vpack.c.bf16 %v78_v44, %v77_v43  ;;  %v1544_v48 = vld [vmem:[#allocation4 + $0xc4] ss:$8 sps:$4 sm:$0xff]   ;;  %v1546_v49 = vld [vmem:[#allocation4 + $0xc0] ss:$8 sps:$4 sm:$0xff]   ;;  %v79_v50 = vld [vmem:[%s2134_s1 + $0x70] sm:$0xff] }
  0x35   :  { %v80_v51 = vld [vmem:[%s2134_s1 + $0x78] sm:$0xff]  ;;  %v1550_v55 = vld [vmem:[#allocation4 + $0xe4] ss:$8 sps:$4 sm:$0xff]   ;;  %v1552_v56 = vld [vmem:[#allocation4 + $0xe0] ss:$8 sps:$4 sm:$0xff]  }
  0x36   :  { %v1547_v52 = vld [vmem:[#allocation4 + $0xd4] ss:$8 sps:$4 sm:$0xff]   ;;  %v88_v53 = vpack.c.bf16 %v80_v51, %v79_v50  ;;  %v1549_v54 = vld [vmem:[#allocation4 + $0xd0] ss:$8 sps:$4 sm:$0xff]   ;;  %v1556_v59 = vld [vmem:[#allocation7] ss:$8 sps:$4 sm:$0xff]  }
  0x37   :  { %510 = vmatpush1.bf16.msra.mxu1 %v1519_v19  ;;  %v1553_v57 = vld [vmem:[#allocation4 + $0xf4] ss:$8 sps:$4 sm:$0xff]   ;;  %v1555_v58 = vld [vmem:[#allocation4 + $0xf0] ss:$8 sps:$4 sm:$0xff]   ;;  %v1558_v60 = vld [vmem:[#allocation7 + $0x4] ss:$8 sps:$4 sm:$0xff]  }
  0x38   :  { %511 = vmatprep.subr.bf16.mxu1 %v1520_v20  ;;  %v1561_v61 = vld [vmem:[#allocation7 + $0x14] ss:$8 sps:$4 sm:$0xff]   ;;  %868 = vmatprep.subr.bf16.mxu0 %v1558_v60  ;;  %v1559_v62 = vld [vmem:[#allocation7 + $0x10] ss:$8 sps:$4 sm:$0xff]   ;;  %v1564_v63 = vld [vmem:[#allocation7 + $0x24] ss:$8 sps:$4 sm:$0xff]   ;;  %v93_v20 = vlaneseq }
  0x39   :  { %869 = vmatpush1.bf16.msra.mxu0 %v1556_v59  ;;  %v1567_v1 = vld [vmem:[#allocation7 + $0x34] ss:$8 sps:$4 sm:$0xff]   ;;  %v1565_v2 = vld [vmem:[#allocation7 + $0x30] ss:$8 sps:$4 sm:$0xff]   ;;  %v1570_v3 = vld [vmem:[#allocation7 + $0x44] ss:$8 sps:$4 sm:$0xff]  }
  0x3a   :  { %870 = vmatprep.subr.bf16.mxu0 %v1561_v61  ;;  %v1568_v4 = vld [vmem:[#allocation7 + $0x40] ss:$8 sps:$4 sm:$0xff]   ;;  %v1573_v5 = vld [vmem:[#allocation7 + $0x54] ss:$8 sps:$4 sm:$0xff]   ;;  %v1571_v6 = vld [vmem:[#allocation7 + $0x50] ss:$8 sps:$4 sm:$0xff]  }
  0x3b   :  { %1332 = vmatmul.mubr.msk.bf16.gmra.mrb[8].mxu0 %vm113_vm0, %v83_v18  ;;  %512 = vmatpush1.bf16.msra.mxu1 %v1522_v22  ;;  %v1576_v7 = vld [vmem:[#allocation7 + $0x64] ss:$8 sps:$4 sm:$0xff]   ;;  %v1574_v8 = vld [vmem:[#allocation7 + $0x60] ss:$8 sps:$4 sm:$0xff]   ;;  %v1579_v9 = vld [vmem:[#allocation7 + $0x74] ss:$8 sps:$4 sm:$0xff]  }
  0x3c   :  { %200 = vmatprep.mubr.bf16.mxu0 %v1728_v0  ;;  %513 = vmatprep.subr.bf16.mxu1 %v1523_v24  ;;  %v1577_v10 = vld [vmem:[#allocation7 + $0x70] ss:$8 sps:$4 sm:$0xff]   ;;  %v1582_v11 = vld [vmem:[#allocation7 + $0x84] ss:$8 sps:$4 sm:$0xff]   ;;  %v1580_v12 = vld [vmem:[#allocation7 + $0x80] ss:$8 sps:$4 sm:$0xff]  }
  0x3d   :  { %871 = vmatpush1.bf16.msra.mxu0 %v1559_v62  ;;  %v1585_v13 = vld [vmem:[#allocation7 + $0x94] ss:$8 sps:$4 sm:$0xff]   ;;  %v1583_v14 = vld [vmem:[#allocation7 + $0x90] ss:$8 sps:$4 sm:$0xff]   ;;  %v1588_v15 = vld [vmem:[#allocation7 + $0xa4] ss:$8 sps:$4 sm:$0xff]  }
  0x3e   :  { %872 = vmatprep.subr.bf16.mxu0 %v1564_v63  ;;  %v1586_v16 = vld [vmem:[#allocation7 + $0xa0] ss:$8 sps:$4 sm:$0xff]   ;;  %v1591_v17 = vld [vmem:[#allocation7 + $0xb4] ss:$8 sps:$4 sm:$0xff]   ;;  %v1589_v18 = vld [vmem:[#allocation7 + $0xb0] ss:$8 sps:$4 sm:$0xff]  }
  0x3f   :  { %514 = vmatpush1.bf16.msra.mxu1 %v1525_v25  ;;  %v1594_v19 = vld [vmem:[#allocation7 + $0xc4] ss:$8 sps:$4 sm:$0xff]   ;;  %v1592_v21 = vld [vmem:[#allocation7 + $0xc0] ss:$8 sps:$4 sm:$0xff]   ;;  %v1597_v22 = vld [vmem:[#allocation7 + $0xd4] ss:$8 sps:$4 sm:$0xff]  }
  0x40   :  { %515 = vmatprep.subr.bf16.mxu1 %v1526_v26  ;;  %v94_v23 = vshrl.u32 %v93_v20, 7  ;;  %v1595_v24 = vld [vmem:[#allocation7 + $0xd0] ss:$8 sps:$4 sm:$0xff]   ;;  %v91_v26 = vld [vmem:[%s2136_s3] sm:$0x3] }
  0x42   :  { %v1885_v25 = vsub.s32 0, %v94_v23 }
  0x43   :  { %1333 = vmatmul.mubr.msk.bf16.gmra.mrb[12].mxu0 %vm113_vm0, %v84_v27  ;;  %516 = vmatpush1.bf16.msra.mxu1 %v1528_v28  ;;  %v1890_v27 = vsub.s32 1, %v94_v23 }
  0x44   :  { %210 = vmatprep.mubr.bf16.mxu0 %v1728_v0  ;;  %517 = vmatprep.subr.bf16.mxu1 %v1529_v31  ;;  %v1893_v28 = vrot.slane %v91_v26, %v1885_v25 }
  0x45   :  { %v1896_v29 = vrot.slane %v91_v26, %v1890_v27 }
  0x47   :  { %518 = vmatpush1.bf16.msra.mxu1 %v1531_v32 }
  0x48   :  { %519 = vmatprep.subr.bf16.mxu1 %v1532_v33 }
  0x4b   :  { %1334 = vmatmul.mubr.msk.bf16.gmra.mrb[16].mxu0 %vm113_vm0, %v85_v34  ;;  %520 = vmatpush1.bf16.msra.mxu1 %v1534_v35 }
  0x4c   :  { %220 = vmatprep.mubr.bf16.mxu0 %v1728_v0  ;;  %521 = vmatprep.subr.bf16.mxu1 %v1535_v38 }
  0x4f   :  { %522 = vmatpush1.bf16.msra.mxu1 %v1537_v39 }
  0x50   :  { %523 = vmatprep.subr.bf16.mxu1 %v1538_v40 }
  0x53   :  { %1335 = vmatmul.mubr.msk.bf16.gmra.mrb[20].mxu0 %vm113_vm0, %v86_v41  ;;  %524 = vmatpush1.bf16.msra.mxu1 %v1540_v42 }
  0x54   :  { %230 = vmatprep.mubr.bf16.mxu0 %v1728_v0  ;;  %525 = vmatprep.subr.bf16.mxu1 %v1541_v45 }
  0x57   :  { %526 = vmatpush1.bf16.msra.mxu1 %v1543_v47 }
  0x58   :  { %527 = vmatprep.subr.bf16.mxu1 %v1544_v48 }
  0x5b   :  { %1336 = vmatmul.mubr.msk.bf16.gmra.mrb[24].mxu0 %vm113_vm0, %v87_v46  ;;  %528 = vmatpush1.bf16.msra.mxu1 %v1546_v49 }
  0x5c   :  { %240 = vmatprep.mubr.bf16.mxu0 %v1728_v0  ;;  %529 = vmatprep.subr.bf16.mxu1 %v1547_v52  ;;  %v1562_v0 = vld [vmem:[#allocation7 + $0x20] ss:$8 sps:$4 sm:$0xff]  }
  0x5d   :  { %873 = vmatpush1.bf16.msra.mxu0 %v1562_v0 }
  0x5e   :  { %874 = vmatprep.subr.bf16.mxu0 %v1567_v1 }
  0x5f   :  { %530 = vmatpush1.bf16.msra.mxu1 %v1549_v54 }
  0x60   :  { %531 = vmatprep.subr.bf16.mxu1 %v1550_v55 }
  0x61   :  { %875 = vmatpush1.bf16.msra.mxu0 %v1565_v2 }
  0x62   :  { %876 = vmatprep.subr.bf16.mxu0 %v1570_v3 }
  0x63   :  { %1337 = vmatmul.mubr.msk.bf16.gmra.mrb[28].mxu0 %vm113_vm0, %v88_v53  ;;  %532 = vmatpush1.bf16.msra.mxu1 %v1552_v56 }
  0x64   :  { %533 = vmatprep.subr.bf16.mxu1 %v1553_v57 }
  0x65   :  { %877 = vmatpush1.bf16.msra.mxu0 %v1568_v4 }
  0x66   :  { %878 = vmatprep.subr.bf16.mxu0 %v1573_v5 }
  0x67   :  { %534 = vmatpush1.bf16.msra.mxu1 %v1555_v58 }
  0x69   :  { %879 = vmatpush1.bf16.msra.mxu0 %v1571_v6 }
  0x6a   :  { %880 = vmatprep.subr.bf16.mxu0 %v1576_v7 }
  0x6d   :  { %881 = vmatpush1.bf16.msra.mxu0 %v1574_v8 }
  0x6e   :  { %882 = vmatprep.subr.bf16.mxu0 %v1579_v9 }
  0x71   :  { %883 = vmatpush1.bf16.msra.mxu0 %v1577_v10 }
  0x72   :  { %884 = vmatprep.subr.bf16.mxu0 %v1582_v11 }
  0x75   :  { %885 = vmatpush1.bf16.msra.mxu0 %v1580_v12 }
  0x76   :  { %886 = vmatprep.subr.bf16.mxu0 %v1585_v13 }
  0x79   :  { %887 = vmatpush1.bf16.msra.mxu0 %v1583_v14 }
  0x7a   :  { %888 = vmatprep.subr.bf16.mxu0 %v1588_v15 }
  0x7d   :  { %889 = vmatpush1.bf16.msra.mxu0 %v1586_v16 }
  0x7e   :  { %890 = vmatprep.subr.bf16.mxu0 %v1591_v17 }
  0x81   :  { %891 = vmatpush1.bf16.msra.mxu0 %v1589_v18 }
  0x82   :  { %892 = vmatprep.subr.bf16.mxu0 %v1594_v19 }
  0x85   :  { %893 = vmatpush1.bf16.msra.mxu0 %v1592_v21 }
  0x86   :  { %894 = vmatprep.subr.bf16.mxu0 %v1597_v22 }
  0x89   :  { %895 = vmatpush1.bf16.msra.mxu0 %v1595_v24 }
  0xfe   :  { %v172_v30 = vpop.f32.mrb[0].mxu0 }
  0xff   :  { %v173_v31 = vadd.f32 %v172_v30, %v1893_v28  ;;  %v174_v32 = vpop.f32.mrb[1].mxu0 }
 0x100   :  { %v175_v33 = vadd.f32 %v174_v32, %v1896_v29  ;;  %v176_v34 = vpop.f32.mrb[2].mxu0 }
 0x101   :  { %v177_v35 = vadd.f32 %v176_v34, %v1893_v28  ;;  %v178_v36 = vpop.f32.mrb[3].mxu0  ;;  %v251_v38 = vmax.f32 %v173_v31, 0.0 }
 0x102   :  { %v179_v37 = vadd.f32 %v178_v36, %v1896_v29  ;;  %v252_v40 = vmax.f32 %v175_v33, 0.0 }
 0x103   :  { %v253_v39 = vmax.f32 %v177_v35, 0.0 }
 0x104   :  { %v254_v41 = vmax.f32 %v179_v37, 0.0 }
 0x105   :  { %v283_v42 = vpack.c.bf16 %v253_v39, %v251_v38 }
 0x106   :  { %v182_v43 = vpop.f32.mrb[4].mxu0  ;;  %v284_v44 = vpack.c.bf16 %v254_v41, %v252_v40 }
 0x107   :  { %v183_v45 = vadd.f32 %v182_v43, %v1893_v28  ;;  %v184_v46 = vpop.f32.mrb[5].mxu0 }
 0x108   :  { %v185_v47 = vadd.f32 %v184_v46, %v1896_v29  ;;  %v186_v48 = vpop.f32.mrb[6].mxu0  ;;  %535 = vmatprep.mubr.bf16.mxu1 %v284_v44 }
 0x109   :  { %v187_v49 = vadd.f32 %v186_v48, %v1893_v28  ;;  %v188_v50 = vpop.f32.mrb[7].mxu0  ;;  %536 = vmatmul.mubr.bf16.vlgmr.msra.gmra.mrb[0].mxu1 %v283_v42  ;;  %v255_v52 = vmax.f32 %v183_v45, 0.0 }
 0x10a   :  { %v189_v51 = vadd.f32 %v188_v50, %v1896_v29  ;;  %v256_v54 = vmax.f32 %v185_v47, 0.0 }
 0x10b   :  { %v257_v53 = vmax.f32 %v187_v49, 0.0 }
 0x10c   :  { %v258_v55 = vmax.f32 %v189_v51, 0.0 }
 0x10d   :  { %v285_v56 = vpack.c.bf16 %v257_v53, %v255_v52 }
 0x10e   :  { %v286_v57 = vpack.c.bf16 %v258_v55, %v256_v54  ;;  %v192_v58 = vpop.f32.mrb[8].mxu0 }
 0x10f   :  { %v193_v59 = vadd.f32 %v192_v58, %v1893_v28  ;;  %v194_v60 = vpop.f32.mrb[9].mxu0 }
 0x110   :  { %v195_v61 = vadd.f32 %v194_v60, %v1896_v29  ;;  %v196_v62 = vpop.f32.mrb[10].mxu0  ;;  %545 = vmatprep.mubr.bf16.mxu1 %v286_v57 }
 0x111   :  { %v197_v63 = vadd.f32 %v196_v62, %v1893_v28  ;;  %v198_v0 = vpop.f32.mrb[11].mxu0  ;;  %546 = vmatmul.mubr.bf16.gmra.mrb[4].mxu1 %v285_v56  ;;  %v259_v2 = vmax.f32 %v193_v59, 0.0 }
 0x112   :  { %v199_v1 = vadd.f32 %v198_v0, %v1896_v29  ;;  %v260_v4 = vmax.f32 %v195_v61, 0.0 }
 0x113   :  { %v261_v3 = vmax.f32 %v197_v63, 0.0 }
 0x114   :  { %v262_v5 = vmax.f32 %v199_v1, 0.0 }
 0x115   :  { %v287_v6 = vpack.c.bf16 %v261_v3, %v259_v2 }
 0x116   :  { %v288_v7 = vpack.c.bf16 %v262_v5, %v260_v4  ;;  %v202_v8 = vpop.f32.mrb[12].mxu0 }
 0x117   :  { %v203_v9 = vadd.f32 %v202_v8, %v1893_v28  ;;  %v204_v10 = vpop.f32.mrb[13].mxu0 }
 0x118   :  { %v205_v11 = vadd.f32 %v204_v10, %v1896_v29  ;;  %v206_v12 = vpop.f32.mrb[14].mxu0  ;;  %555 = vmatprep.mubr.bf16.mxu1 %v288_v7 }
 0x119   :  { %v207_v13 = vadd.f32 %v206_v12, %v1893_v28  ;;  %v208_v14 = vpop.f32.mrb[15].mxu0  ;;  %556 = vmatmul.mubr.bf16.gmra.mrb[8].mxu1 %v287_v6  ;;  %v263_v16 = vmax.f32 %v203_v9, 0.0 }
 0x11a   :  { %v209_v15 = vadd.f32 %v208_v14, %v1896_v29  ;;  %v264_v18 = vmax.f32 %v205_v11, 0.0 }
 0x11b   :  { %v265_v17 = vmax.f32 %v207_v13, 0.0 }
 0x11c   :  { %v266_v19 = vmax.f32 %v209_v15, 0.0 }
 0x11d   :  { %v289_v20 = vpack.c.bf16 %v265_v17, %v263_v16 }
 0x11e   :  { %v290_v21 = vpack.c.bf16 %v266_v19, %v264_v18  ;;  %v212_v22 = vpop.f32.mrb[16].mxu0  ;;  %v1600_v18 = vld [vmem:[#allocation7 + $0xe4] ss:$8 sps:$4 sm:$0xff]   ;;  %v1598_v19 = vld [vmem:[#allocation7 + $0xe0] ss:$8 sps:$4 sm:$0xff]  }
 0x11f   :  { %v213_v23 = vadd.f32 %v212_v22, %v1893_v28  ;;  %v214_v24 = vpop.f32.mrb[17].mxu0  ;;  %896 = vmatprep.subr.bf16.mxu0 %v1600_v18  ;;  %v1606_v22 = vld [vmem:[%s2141_s8 + $0x48] sm:$0xff]  }
 0x120   :  { %v215_v26 = vadd.f32 %v214_v24, %v1896_v29  ;;  %v216_v30 = vpop.f32.mrb[18].mxu0  ;;  %565 = vmatprep.mubr.bf16.mxu1 %v290_v21  ;;  %897 = vmatpush1.bf16.msra.mxu0 %v1598_v19  ;;  %v1601_v21 = vld [vmem:[#allocation7 + $0xf0] ss:$8 sps:$4 sm:$0xff]  }
 0x121   :  { %v217_v31 = vadd.f32 %v216_v30, %v1893_v28  ;;  %v218_v32 = vpop.f32.mrb[19].mxu0  ;;  %566 = vmatmul.mubr.bf16.gmra.mrb[12].mxu1 %v289_v20  ;;  %v267_v34 = vmax.f32 %v213_v23, 0.0  ;;  %v1603_v20 = vld [vmem:[#allocation7 + $0xf4] ss:$8 sps:$4 sm:$0xff]   ;;  %v1607_v23 = vld [vmem:[%s2141_s8 + $0x8] sm:$0xff]  }
 0x122   :  { %v219_v33 = vadd.f32 %v218_v32, %v1896_v29  ;;  %v268_v36 = vmax.f32 %v215_v26, 0.0  ;;  %898 = vmatprep.subr.bf16.mxu0 %v1603_v20  ;;  %v1608_v24 = vld [vmem:[%s2141_s8 + $0x50] sm:$0xff]   ;;  %v1610_v30 = vld [vmem:[%s2141_s8 + $0x58] sm:$0xff]   ;;  %v1959_v32 = vld [vmem:[%s2141_s8 + $0x60] sm:$0xff]  }
 0x123   :  { %v269_v35 = vmax.f32 %v217_v31, 0.0  ;;  %v1609_v26 = vld [vmem:[%s2141_s8 + $0x10] sm:$0xff]   ;;  %v1954_v31 = vld [vmem:[%s2141_s8 + $0x18] sm:$0xff]  }
 0x124   :  { %v270_v37 = vmax.f32 %v219_v33, 0.0  ;;  %899 = vmatpush1.bf16.msra.mxu0 %v1601_v21  ;;  %v1966_v33 = vld [vmem:[%s2141_s8 + $0x20] sm:$0xff]  }
 0x125   :  { %v291_v38 = vpack.c.bf16 %v269_v35, %v267_v34  ;;  %v1971_v34 = vld [vmem:[%s2141_s8 + $0x68] sm:$0xff]   ;;  %v331_v35 = vld [vmem:[%s2138_s5] sm:$0x3] }
 0x126   :  { %v292_v39 = vpack.c.bf16 %v270_v37, %v268_v36  ;;  %v222_v40 = vpop.f32.mrb[20].mxu0  ;;  %v1979_v36 = vrot.slane %v331_v35, %v1885_v25  ;;  %v1982_v37 = vrot.slane %v331_v35, %v1890_v27 }
 0x127   :  { %v223_v41 = vadd.f32 %v222_v40, %v1893_v28  ;;  %v224_v42 = vpop.f32.mrb[21].mxu0 }
 0x128   :  { %v225_v43 = vadd.f32 %v224_v42, %v1896_v29  ;;  %v226_v44 = vpop.f32.mrb[22].mxu0  ;;  %575 = vmatprep.mubr.bf16.mxu1 %v292_v39 }
 0x129   :  { %v227_v45 = vadd.f32 %v226_v44, %v1893_v28  ;;  %v228_v46 = vpop.f32.mrb[23].mxu0  ;;  %576 = vmatmul.mubr.bf16.gmra.mrb[16].mxu1 %v291_v38  ;;  %v271_v48 = vmax.f32 %v223_v41, 0.0 }
 0x12a   :  { %v229_v47 = vadd.f32 %v228_v46, %v1896_v29  ;;  %v272_v50 = vmax.f32 %v225_v43, 0.0 }
 0x12b   :  { %v273_v49 = vmax.f32 %v227_v45, 0.0 }
 0x12c   :  { %v274_v51 = vmax.f32 %v229_v47, 0.0 }
 0x12d   :  { %v293_v52 = vpack.c.bf16 %v273_v49, %v271_v48 }
 0x12e   :  { %v294_v53 = vpack.c.bf16 %v274_v51, %v272_v50  ;;  %v232_v54 = vpop.f32.mrb[24].mxu0 }
 0x12f   :  { %v233_v55 = vadd.f32 %v232_v54, %v1893_v28  ;;  %v234_v56 = vpop.f32.mrb[25].mxu0 }
 0x130   :  { %v235_v57 = vadd.f32 %v234_v56, %v1896_v29  ;;  %v236_v58 = vpop.f32.mrb[26].mxu0  ;;  %585 = vmatprep.mubr.bf16.mxu1 %v294_v53 }
 0x131   :  { %v237_v59 = vadd.f32 %v236_v58, %v1893_v28  ;;  %v238_v60 = vpop.f32.mrb[27].mxu0  ;;  %586 = vmatmul.mubr.bf16.gmra.mrb[20].mxu1 %v293_v52  ;;  %v275_v62 = vmax.f32 %v233_v55, 0.0 }
 0x132   :  { %v239_v61 = vadd.f32 %v238_v60, %v1896_v29  ;;  %v276_v0 = vmax.f32 %v235_v57, 0.0 }
 0x133   :  { %v277_v63 = vmax.f32 %v237_v59, 0.0 }
 0x134   :  { %v278_v1 = vmax.f32 %v239_v61, 0.0 }
 0x135   :  { %v295_v2 = vpack.c.bf16 %v277_v63, %v275_v62 }
 0x136   :  { %v296_v3 = vpack.c.bf16 %v278_v1, %v276_v0  ;;  %v242_v4 = vpop.f32.mrb[28].mxu0 }
 0x137   :  { %v243_v5 = vadd.f32 %v242_v4, %v1893_v28  ;;  %v244_v6 = vpop.f32.mrb[29].mxu0 }
 0x138   :  { %v245_v7 = vadd.f32 %v244_v6, %v1896_v29  ;;  %v246_v8 = vpop.f32.mrb[30].mxu0  ;;  %595 = vmatprep.mubr.bf16.mxu1 %v296_v3 }
 0x139   :  { %v247_v9 = vadd.f32 %v246_v8, %v1893_v28  ;;  %v248_v10 = vpop.f32.mrb[31].mxu0  ;;  %596 = vmatmul.mubr.bf16.gmra.mrb[24].mxu1 %v295_v2  ;;  %v279_v12 = vmax.f32 %v243_v5, 0.0  ;;  %v1604_v28 = vld [vmem:[%s2141_s8 + $0x40] sm:$0xff]  }
 0x13a   :  { %v249_v11 = vadd.f32 %v248_v10, %v1896_v29  ;;  %v280_v14 = vmax.f32 %v245_v7, 0.0  ;;  %v1605_v29 = vld [vmem:[%s2141_s8] sm:$0xff]   ;;  %1483 = vmatprep.subr.bf16.mxu1 %v1604_v28  ;;  %1419 = vmatprep.subr.bf16.mxu0 %v1604_v28 }
 0x13b   :  { %v281_v13 = vmax.f32 %v247_v9, 0.0  ;;  %1491 = vmatpush3.bf16.msra.mxu1 %v1605_v29 }
 0x13c   :  { %v282_v15 = vmax.f32 %v249_v11, 0.0  ;;  %1484 = vmatprep.subr.bf16.mxu1 %v1606_v22 }
 0x13d   :  { %v297_v16 = vpack.c.bf16 %v281_v13, %v279_v12 }
 0x13e   :  { %v298_v17 = vpack.c.bf16 %v282_v15, %v280_v14 }
 0x13f   :  { %1492 = vmatpush3.bf16.msra.mxu1 %v1607_v23 }
 0x140   :  { %605 = vmatprep.mubr.bf16.mxu1 %v298_v17  ;;  %1485 = vmatprep.subr.bf16.mxu1 %v1608_v24 }
 0x141   :  { %606 = vmatmul.mubr.bf16.gmra.mrb[28].mxu1 %v297_v16 }
 0x143   :  { %1493 = vmatpush3.bf16.msra.mxu1 %v1609_v26 }
 0x144   :  { %1486 = vmatprep.subr.bf16.mxu1 %v1610_v30 }
 0x147   :  { %1494 = vmatpush3.bf16.msra.mxu1 %v1954_v31 }
 0x148   :  { %1487 = vmatprep.subr.bf16.mxu1 %v1959_v32 }
 0x14b   :  { %1495 = vmatpush3.bf16.msra.mxu1 %v1966_v33 }
 0x14c   :  { %1488 = vmatprep.subr.bf16.mxu1 %v1971_v34 }
 0x1dc   :  { %v537_v38 = vpop.f32.mrb[0].mxu1 }
 0x1dd   :  { %v538_v39 = vadd.f32 %v537_v38, %v1979_v36  ;;  %v539_v40 = vpop.f32.mrb[1].mxu1 }
 0x1de   :  { %v540_v41 = vadd.f32 %v539_v40, %v1982_v37  ;;  %v541_v42 = vpop.f32.mrb[2].mxu1 }
 0x1df   :  { %v542_v43 = vadd.f32 %v541_v42, %v1979_v36  ;;  %v543_v44 = vpop.f32.mrb[3].mxu1  ;;  %v616_v46 = vmax.f32 %v538_v39, 0.0 }
 0x1e0   :  { %v544_v45 = vadd.f32 %v543_v44, %v1982_v37  ;;  %v617_v48 = vmax.f32 %v540_v41, 0.0 }
 0x1e1   :  { %v618_v47 = vmax.f32 %v542_v43, 0.0 }
 0x1e2   :  { %v619_v49 = vmax.f32 %v544_v45, 0.0 }
 0x1e3   :  { %v648_v50 = vpack.c.bf16 %v618_v47, %v616_v46 }
 0x1e4   :  { %v649_v51 = vpack.c.bf16 %v619_v49, %v617_v48  ;;  %v547_v52 = vpop.f32.mrb[4].mxu1 }
 0x1e5   :  { %v548_v53 = vadd.f32 %v547_v52, %v1979_v36  ;;  %v549_v54 = vpop.f32.mrb[5].mxu1 }
 0x1e6   :  { %v550_v55 = vadd.f32 %v549_v54, %v1982_v37  ;;  %v551_v56 = vpop.f32.mrb[6].mxu1  ;;  %900 = vmatprep.mubr.bf16.mxu0 %v649_v51 }
 0x1e7   :  { %v552_v57 = vadd.f32 %v551_v56, %v1979_v36  ;;  %v553_v58 = vpop.f32.mrb[7].mxu1  ;;  %901 = vmatmul.mubr.bf16.vlgmr.msra.gmra.mrb[32].mxu0 %v648_v50  ;;  %v620_v60 = vmax.f32 %v548_v53, 0.0 }
 0x1e8   :  { %v554_v59 = vadd.f32 %v553_v58, %v1982_v37  ;;  %1420 = vmatpush3.bf16.msra.mxu0 %v1605_v29  ;;  %v621_v62 = vmax.f32 %v550_v55, 0.0 }
 0x1e9   :  { %v622_v61 = vmax.f32 %v552_v57, 0.0  ;;  %1421 = vmatprep.subr.bf16.mxu0 %v1606_v22 }
 0x1ea   :  { %v623_v63 = vmax.f32 %v554_v59, 0.0 }
 0x1eb   :  { %v650_v0 = vpack.c.bf16 %v622_v61, %v620_v60 }
 0x1ec   :  { %v651_v1 = vpack.c.bf16 %v623_v63, %v621_v62  ;;  %v557_v2 = vpop.f32.mrb[8].mxu1  ;;  %1422 = vmatpush3.bf16.msra.mxu0 %v1607_v23 }
 0x1ed   :  { %v558_v3 = vadd.f32 %v557_v2, %v1979_v36  ;;  %v559_v4 = vpop.f32.mrb[9].mxu1  ;;  %1423 = vmatprep.subr.bf16.mxu0 %v1608_v24 }
 0x1ee   :  { %v560_v5 = vadd.f32 %v559_v4, %v1982_v37  ;;  %v561_v6 = vpop.f32.mrb[10].mxu1  ;;  %910 = vmatprep.mubr.bf16.mxu0 %v651_v1 }
 0x1ef   :  { %v562_v7 = vadd.f32 %v561_v6, %v1979_v36  ;;  %v563_v8 = vpop.f32.mrb[11].mxu1  ;;  %911 = vmatmul.mubr.bf16.gmra.mrb[36].mxu0 %v650_v0  ;;  %v624_v10 = vmax.f32 %v558_v3, 0.0 }
 0x1f0   :  { %v564_v9 = vadd.f32 %v563_v8, %v1982_v37  ;;  %1424 = vmatpush3.bf16.msra.mxu0 %v1609_v26  ;;  %v625_v12 = vmax.f32 %v560_v5, 0.0 }
 0x1f1   :  { %v626_v11 = vmax.f32 %v562_v7, 0.0  ;;  %1425 = vmatprep.subr.bf16.mxu0 %v1610_v30 }
 0x1f2   :  { %v627_v13 = vmax.f32 %v564_v9, 0.0 }
 0x1f3   :  { %v652_v14 = vpack.c.bf16 %v626_v11, %v624_v10 }
 0x1f4   :  { %v653_v15 = vpack.c.bf16 %v627_v13, %v625_v12  ;;  %v567_v16 = vpop.f32.mrb[12].mxu1  ;;  %1426 = vmatpush3.bf16.msra.mxu0 %v1954_v31 }
 0x1f5   :  { %v568_v17 = vadd.f32 %v567_v16, %v1979_v36  ;;  %v569_v18 = vpop.f32.mrb[13].mxu1  ;;  %1427 = vmatprep.subr.bf16.mxu0 %v1959_v32 }
 0x1f6   :  { %v570_v19 = vadd.f32 %v569_v18, %v1982_v37  ;;  %v571_v20 = vpop.f32.mrb[14].mxu1  ;;  %920 = vmatprep.mubr.bf16.mxu0 %v653_v15 }
 0x1f7   :  { %v572_v21 = vadd.f32 %v571_v20, %v1979_v36  ;;  %v573_v28 = vpop.f32.mrb[15].mxu1  ;;  %921 = vmatmul.mubr.bf16.gmra.mrb[40].mxu0 %v652_v14  ;;  %v628_v22 = vmax.f32 %v568_v17, 0.0 }
 0x1f8   :  { %v574_v29 = vadd.f32 %v573_v28, %v1982_v37  ;;  %1428 = vmatpush3.bf16.msra.mxu0 %v1966_v33  ;;  %v629_v24 = vmax.f32 %v570_v19, 0.0 }
 0x1f9   :  { %v630_v23 = vmax.f32 %v572_v21, 0.0  ;;  %1429 = vmatprep.subr.bf16.mxu0 %v1971_v34 }
 0x1fa   :  { %v631_v26 = vmax.f32 %v574_v29, 0.0 }
 0x1fb   :  { %v654_v30 = vpack.c.bf16 %v630_v23, %v628_v22 }
 0x1fc   :  { %v655_v31 = vpack.c.bf16 %v631_v26, %v629_v24  ;;  %v577_v32 = vpop.f32.mrb[16].mxu1  ;;  %v1615_v24 = vld [vmem:[%s2141_s8 + $0x28] sm:$0xff]   ;;  %v1618_v26 = vld [vmem:[%s2141_s8 + $0x78] sm:$0xff]  }
 0x1fd   :  { %v578_v35 = vadd.f32 %v577_v32, %v1979_v36  ;;  %v579_v38 = vpop.f32.mrb[17].mxu1  ;;  %1430 = vmatpush3.bf16.msra.mxu0 %v1615_v24  ;;  %1496 = vmatpush3.bf16.msra.mxu1 %v1615_v24 }
 0x1fe   :  { %v580_v39 = vadd.f32 %v579_v38, %v1982_v37  ;;  %v581_v40 = vpop.f32.mrb[18].mxu1  ;;  %930 = vmatprep.mubr.bf16.mxu0 %v655_v31  ;;  %v696_v31 = vld [vmem:[%s2140_s7] sm:$0x3] }
 0x1ff   :  { %v582_v41 = vadd.f32 %v581_v40, %v1979_v36  ;;  %v583_v42 = vpop.f32.mrb[19].mxu1  ;;  %931 = vmatmul.mubr.bf16.gmra.mrb[44].mxu0 %v654_v30  ;;  %v632_v43 = vmax.f32 %v578_v35, 0.0  ;;  %v1619_v30 = vld [vmem:[%s2141_s8 + $0x38] sm:$0xff]   ;;  %v2039_v32 = vrot.slane %v696_v31, %v1885_v25  ;;  %v2042_v35 = vrot.slane %v696_v31, %v1890_v27 }
 0x200   :  { %v584_v33 = vadd.f32 %v583_v42, %v1982_v37  ;;  %v633_v44 = vmax.f32 %v580_v39, 0.0 }
 0x201   :  { %v634_v34 = vmax.f32 %v582_v41, 0.0 }
 0x202   :  { %v635_v45 = vmax.f32 %v584_v33, 0.0 }
 0x203   :  { %v656_v46 = vpack.c.bf16 %v634_v34, %v632_v43 }
 0x204   :  { %v657_v47 = vpack.c.bf16 %v635_v45, %v633_v44  ;;  %v587_v48 = vpop.f32.mrb[20].mxu1 }
 0x205   :  { %v588_v49 = vadd.f32 %v587_v48, %v1979_v36  ;;  %v589_v50 = vpop.f32.mrb[21].mxu1 }
 0x206   :  { %v590_v51 = vadd.f32 %v589_v50, %v1982_v37  ;;  %v591_v52 = vpop.f32.mrb[22].mxu1  ;;  %940 = vmatprep.mubr.bf16.mxu0 %v657_v47 }
 0x207   :  { %v592_v53 = vadd.f32 %v591_v52, %v1979_v36  ;;  %v593_v54 = vpop.f32.mrb[23].mxu1  ;;  %941 = vmatmul.mubr.bf16.gmra.mrb[48].mxu0 %v656_v46  ;;  %v636_v56 = vmax.f32 %v588_v49, 0.0 }
 0x208   :  { %v594_v55 = vadd.f32 %v593_v54, %v1982_v37  ;;  %v637_v58 = vmax.f32 %v590_v51, 0.0 }
 0x209   :  { %v638_v57 = vmax.f32 %v592_v53, 0.0 }
 0x20a   :  { %v639_v59 = vmax.f32 %v594_v55, 0.0 }
 0x20b   :  { %v658_v60 = vpack.c.bf16 %v638_v57, %v636_v56 }
 0x20c   :  { %v659_v61 = vpack.c.bf16 %v639_v59, %v637_v58  ;;  %v597_v62 = vpop.f32.mrb[24].mxu1 }
 0x20d   :  { %v598_v63 = vadd.f32 %v597_v62, %v1979_v36  ;;  %v599_v0 = vpop.f32.mrb[25].mxu1 }
 0x20e   :  { %v600_v1 = vadd.f32 %v599_v0, %v1982_v37  ;;  %v601_v2 = vpop.f32.mrb[26].mxu1  ;;  %950 = vmatprep.mubr.bf16.mxu0 %v659_v61 }
 0x20f   :  { %v602_v3 = vadd.f32 %v601_v2, %v1979_v36  ;;  %v603_v4 = vpop.f32.mrb[27].mxu1  ;;  %951 = vmatmul.mubr.bf16.gmra.mrb[52].mxu0 %v658_v60  ;;  %v640_v6 = vmax.f32 %v598_v63, 0.0 }
 0x210   :  { %v604_v5 = vadd.f32 %v603_v4, %v1982_v37  ;;  %v641_v8 = vmax.f32 %v600_v1, 0.0 }
 0x211   :  { %v642_v7 = vmax.f32 %v602_v3, 0.0 }
 0x212   :  { %v643_v9 = vmax.f32 %v604_v5, 0.0 }
 0x213   :  { %v660_v10 = vpack.c.bf16 %v642_v7, %v640_v6 }
 0x214   :  { %v661_v11 = vpack.c.bf16 %v643_v9, %v641_v8  ;;  %v607_v12 = vpop.f32.mrb[28].mxu1 }
 0x215   :  { %v608_v13 = vadd.f32 %v607_v12, %v1979_v36  ;;  %v609_v14 = vpop.f32.mrb[29].mxu1 }
 0x216   :  { %v610_v15 = vadd.f32 %v609_v14, %v1982_v37  ;;  %v611_v16 = vpop.f32.mrb[30].mxu1  ;;  %960 = vmatprep.mubr.bf16.mxu0 %v661_v11 }
 0x217   :  { %v612_v17 = vadd.f32 %v611_v16, %v1979_v36  ;;  %v613_v18 = vpop.f32.mrb[31].mxu1  ;;  %961 = vmatmul.mubr.bf16.gmra.mrb[56].mxu0 %v660_v10  ;;  %v644_v20 = vmax.f32 %v608_v13, 0.0  ;;  %v1616_v36 = vld [vmem:[%s2141_s8 + $0x70] sm:$0xff]  }
 0x218   :  { %v614_v19 = vadd.f32 %v613_v18, %v1982_v37  ;;  %v645_v28 = vmax.f32 %v610_v15, 0.0  ;;  %v1617_v37 = vld [vmem:[%s2141_s8 + $0x30] sm:$0xff]   ;;  %1431 = vmatprep.subr.bf16.mxu0 %v1616_v36  ;;  %1489 = vmatprep.subr.bf16.mxu1 %v1616_v36 }
 0x219   :  { %v646_v21 = vmax.f32 %v612_v17, 0.0  ;;  %1432 = vmatpush3.bf16.msra.mxu0 %v1617_v37  ;;  %1497 = vmatpush3.bf16.msra.mxu1 %v1617_v37 }
 0x21a   :  { %v647_v29 = vmax.f32 %v614_v19, 0.0  ;;  %1433 = vmatprep.subr.bf16.mxu0 %v1618_v26  ;;  %1490 = vmatprep.subr.bf16.mxu1 %v1618_v26 }
 0x21b   :  { %v662_v22 = vpack.c.bf16 %v646_v21, %v644_v20 }
 0x21c   :  { %v663_v23 = vpack.c.bf16 %v647_v29, %v645_v28 }
 0x21d   :  { %1434 = vmatpush3.bf16.msra.mxu0 %v1619_v30  ;;  %1498 = vmatpush3.bf16.msra.mxu1 %v1619_v30 }
 0x21e   :  { %970 = vmatprep.mubr.bf16.mxu0 %v663_v23 }
 0x21f   :  { %971 = vmatmul.mubr.bf16.gmra.mrb[60].mxu0 %v662_v22 }
 0x2ba   :  { %v902_v38 = vpop.f32.mrb[32].mxu0 }
 0x2bb   :  { %v903_v39 = vadd.f32 %v902_v38, %v2039_v32  ;;  %v904_v40 = vpop.f32.mrb[33].mxu0 }
 0x2bc   :  { %v905_v41 = vadd.f32 %v904_v40, %v2042_v35  ;;  %v906_v42 = vpop.f32.mrb[34].mxu0 }
 0x2bd   :  { %v907_v33 = vadd.f32 %v906_v42, %v2039_v32  ;;  %v908_v43 = vpop.f32.mrb[35].mxu0  ;;  %v981_v44 = vmax.f32 %v903_v39, 0.0 }
 0x2be   :  { %v909_v34 = vadd.f32 %v908_v43, %v2042_v35  ;;  %v982_v46 = vmax.f32 %v905_v41, 0.0 }
 0x2bf   :  { %v983_v45 = vmax.f32 %v907_v33, 0.0 }
 0x2c0   :  { %v984_v25 = vmax.f32 %v909_v34, 0.0 }
 0x2c1   :  { %v1013_v47 = vpack.c.bf16 %v983_v45, %v981_v44 }
 0x2c2   :  { %v1014_v48 = vpack.c.bf16 %v984_v25, %v982_v46  ;;  %v912_v27 = vpop.f32.mrb[36].mxu0 }
 0x2c3   :  { %v913_v49 = vadd.f32 %v912_v27, %v2039_v32  ;;  %v914_v50 = vpop.f32.mrb[37].mxu0 }
 0x2c4   :  { %v915_v51 = vadd.f32 %v914_v50, %v2042_v35  ;;  %v916_v52 = vpop.f32.mrb[38].mxu0  ;;  %1196 = vmatprep.mubr.bf16.mxu0 %v1014_v48 }
 0x2c5   :  { %v917_v53 = vadd.f32 %v916_v52, %v2039_v32  ;;  %v918_v54 = vpop.f32.mrb[39].mxu0  ;;  %1197 = vmatmul.mubr.bf16.vlgmr.msra.gmra.mrb[64].mxu0 %v1013_v47  ;;  %v985_v56 = vmax.f32 %v913_v49, 0.0 }
 0x2c6   :  { %v919_v55 = vadd.f32 %v918_v54, %v2042_v35  ;;  %v986_v58 = vmax.f32 %v915_v51, 0.0 }
 0x2c7   :  { %v987_v57 = vmax.f32 %v917_v53, 0.0 }
 0x2c8   :  { %v988_v59 = vmax.f32 %v919_v55, 0.0 }
 0x2c9   :  { %v1015_v60 = vpack.c.bf16 %v987_v57, %v985_v56 }
 0x2ca   :  { %v1016_v61 = vpack.c.bf16 %v988_v59, %v986_v58  ;;  %v922_v62 = vpop.f32.mrb[40].mxu0 }
 0x2cb   :  { %v923_v63 = vadd.f32 %v922_v62, %v2039_v32  ;;  %v924_v0 = vpop.f32.mrb[41].mxu0 }
 0x2cc   :  { %v925_v1 = vadd.f32 %v924_v0, %v2042_v35  ;;  %v926_v2 = vpop.f32.mrb[42].mxu0  ;;  %1204 = vmatprep.mubr.bf16.mxu0 %v1016_v61 }
 0x2cd   :  { %v927_v3 = vadd.f32 %v926_v2, %v2039_v32  ;;  %v928_v4 = vpop.f32.mrb[43].mxu0  ;;  %1205 = vmatmul.mubr.bf16.gmra.mrb[68].mxu0 %v1015_v60  ;;  %v989_v6 = vmax.f32 %v923_v63, 0.0 }
 0x2ce   :  { %v929_v5 = vadd.f32 %v928_v4, %v2042_v35  ;;  %v990_v8 = vmax.f32 %v925_v1, 0.0 }
 0x2cf   :  { %v991_v7 = vmax.f32 %v927_v3, 0.0 }
 0x2d0   :  { %v992_v9 = vmax.f32 %v929_v5, 0.0 }
 0x2d1   :  { %v1017_v10 = vpack.c.bf16 %v991_v7, %v989_v6 }
 0x2d2   :  { %v1018_v11 = vpack.c.bf16 %v992_v9, %v990_v8  ;;  %v932_v12 = vpop.f32.mrb[44].mxu0 }
 0x2d3   :  { %v933_v13 = vadd.f32 %v932_v12, %v2039_v32  ;;  %v934_v14 = vpop.f32.mrb[45].mxu0 }
 0x2d4   :  { %v935_v15 = vadd.f32 %v934_v14, %v2042_v35  ;;  %v936_v16 = vpop.f32.mrb[46].mxu0  ;;  %1212 = vmatprep.mubr.bf16.mxu0 %v1018_v11 }
 0x2d5   :  { %v937_v17 = vadd.f32 %v936_v16, %v2039_v32  ;;  %v938_v18 = vpop.f32.mrb[47].mxu0  ;;  %1213 = vmatmul.mubr.bf16.gmra.mrb[72].mxu0 %v1017_v10  ;;  %v993_v20 = vmax.f32 %v933_v13, 0.0 }
 0x2d6   :  { %v939_v19 = vadd.f32 %v938_v18, %v2042_v35  ;;  %v994_v28 = vmax.f32 %v935_v15, 0.0 }
 0x2d7   :  { %v995_v21 = vmax.f32 %v937_v17, 0.0 }
 0x2d8   :  { %v996_v29 = vmax.f32 %v939_v19, 0.0 }
 0x2d9   :  { %v1019_v22 = vpack.c.bf16 %v995_v21, %v993_v20  ;;  %v2079_v21 = vld [vmem:[%s2142_s9] ss:$0 sm:$0xff] }
 0x2da   :  { %v1020_v23 = vpack.c.bf16 %v996_v29, %v994_v28  ;;  %v942_v24 = vpop.f32.mrb[48].mxu0 }
 0x2db   :  { %v943_v36 = vadd.f32 %v942_v24, %v2039_v32  ;;  %v944_v37 = vpop.f32.mrb[49].mxu0 }
 0x2dc   :  { %v945_v26 = vadd.f32 %v944_v37, %v2042_v35  ;;  %v946_v30 = vpop.f32.mrb[50].mxu0  ;;  %1220 = vmatprep.mubr.bf16.mxu1 %v1020_v23 }
 0x2dd   :  { %v947_v31 = vadd.f32 %v946_v30, %v2039_v32  ;;  %v948_v38 = vpop.f32.mrb[51].mxu0  ;;  %1221 = vmatmul.mubr.bf16.vlgmr.msra.gmra.mrb[32].mxu1 %v1019_v22  ;;  %v997_v40 = vmax.f32 %v943_v36, 0.0 }
 0x2de   :  { %v949_v39 = vadd.f32 %v948_v38, %v2042_v35  ;;  %v998_v42 = vmax.f32 %v945_v26, 0.0 }
 0x2df   :  { %v999_v41 = vmax.f32 %v947_v31, 0.0 }
 0x2e0   :  { %v1000_v33 = vmax.f32 %v949_v39, 0.0 }
 0x2e1   :  { %v1021_v43 = vpack.c.bf16 %v999_v41, %v997_v40  ;;  %v2087_v40 = vstv %s2133_s0  ;;  %s1729_s0 = smov [#allocation9]  }
 0x2e2   :  { %v1022_v34 = vpack.c.bf16 %v1000_v33, %v998_v42  ;;  %v952_v44 = vpop.f32.mrb[52].mxu0  ;;  %s1315_s26 = sshll.u32 %s1729_s0, 4  ;;  %s1316_s26 = int_to_ptr.vmem [resolvable:$true] %s1315_s26 }
 0x2e3   :  { %v953_v45 = vadd.f32 %v952_v44, %v2039_v32  ;;  %v954_v46 = vpop.f32.mrb[53].mxu0  ;;  %s1696_s27 = scalar_lea.vmem %s1316_s26, 2048  ;;  %p1701_p3 = scmp.lt.s32.totalorder %s1316_s26, %s1316_s26 }
 0x2e4   :  { %v955_v25 = vadd.f32 %v954_v46, %v2042_v35  ;;  %v956_v47 = vpop.f32.mrb[54].mxu0  ;;  %1228 = vmatprep.mubr.bf16.mxu1 %v1022_v34  ;;  %p1697_p2 = scmp.ne.s32.totalorder %s1316_s26, %s1696_s27  ;;  %p1702_p4 = scmp.lt.s32.totalorder %s1696_s27, %s1696_s27 }
 0x2e5   :  { %v957_v48 = vadd.f32 %v956_v47, %v2039_v32  ;;  %v958_v27 = vpop.f32.mrb[55].mxu0  ;;  %1229 = vmatmul.mubr.bf16.gmra.mrb[36].mxu1 %v1021_v43  ;;  %v1001_v50 = vmax.f32 %v953_v45, 0.0 }
 0x2e6   :  { %v959_v49 = vadd.f32 %v958_v27, %v2042_v35  ;;  %v1002_v52 = vmax.f32 %v955_v25, 0.0  ;;  %p1703_p5 = por %p1702_p4, %p1701_p3 }
 0x2e7   :  { %v1003_v51 = vmax.f32 %v957_v48, 0.0 }
 0x2e8   :  { %v1004_v53 = vmax.f32 %v959_v49, 0.0  ;;  %p1704_p6 = pnand %p1703_p5, %p1697_p2 }
 0x2e9   :  { %v1023_v54 = vpack.c.bf16 %v1003_v51, %v1001_v50 }
 0x2ea   :  { %v1024_v55 = vpack.c.bf16 %v1004_v53, %v1002_v52  ;;  %v962_v56 = vpop.f32.mrb[56].mxu0 }
 0x2eb   :  { %v963_v57 = vadd.f32 %v962_v56, %v2039_v32  ;;  %v964_v58 = vpop.f32.mrb[57].mxu0 }
 0x2ec   :  { %v965_v59 = vadd.f32 %v964_v58, %v2042_v35  ;;  %v966_v60 = vpop.f32.mrb[58].mxu0  ;;  %1236 = vmatprep.mubr.bf16.mxu1 %v1024_v55 }
 0x2ed   :  { %v967_v61 = vadd.f32 %v966_v60, %v2039_v32  ;;  %v968_v62 = vpop.f32.mrb[59].mxu0  ;;  %1237 = vmatmul.mubr.bf16.gmra.mrb[40].mxu1 %v1023_v54  ;;  %v1005_v0 = vmax.f32 %v963_v57, 0.0 }
 0x2ee   :  { %v969_v63 = vadd.f32 %v968_v62, %v2042_v35  ;;  %v1006_v2 = vmax.f32 %v965_v59, 0.0 }
 0x2ef   :  { %v1007_v1 = vmax.f32 %v967_v61, 0.0 }
 0x2f0   :  { %v1008_v3 = vmax.f32 %v969_v63, 0.0 }
 0x2f1   :  { %v1025_v4 = vpack.c.bf16 %v1007_v1, %v1005_v0 }
 0x2f2   :  { %v1026_v5 = vpack.c.bf16 %v1008_v3, %v1006_v2  ;;  %v972_v6 = vpop.f32.mrb[60].mxu0 }
 0x2f3   :  { %v973_v7 = vadd.f32 %v972_v6, %v2039_v32  ;;  %v974_v8 = vpop.f32.mrb[61].mxu0 }
 0x2f4   :  { %v975_v9 = vadd.f32 %v974_v8, %v2042_v35  ;;  %v976_v10 = vpop.f32.mrb[62].mxu0  ;;  %1244 = vmatprep.mubr.bf16.mxu1 %v1026_v5 }
 0x2f5   :  { %v977_v11 = vadd.f32 %v976_v10, %v2039_v32  ;;  %v978_v12 = vpop.f32.mrb[63].mxu0  ;;  %1245 = vmatmul.mubr.bf16.gmra.mrb[44].mxu1 %v1025_v4  ;;  %v1009_v14 = vmax.f32 %v973_v7, 0.0 }
 0x2f6   :  { %v979_v13 = vadd.f32 %v978_v12, %v2042_v35  ;;  %v1010_v16 = vmax.f32 %v975_v9, 0.0 }
 0x2f7   :  { %v1011_v15 = vmax.f32 %v977_v11, 0.0 }
 0x2f8   :  { %v1012_v17 = vmax.f32 %v979_v13, 0.0 }
 0x2f9   :  { %v1027_v18 = vpack.c.bf16 %v1011_v15, %v1009_v14 }
 0x2fa   :  { %v1028_v19 = vpack.c.bf16 %v1012_v17, %v1010_v16 }
 0x2fc   :  { %1252 = vmatprep.mubr.bf16.mxu1 %v1028_v19 }
 0x2fd   :  { %1253 = vmatmul.mubr.bf16.gmra.mrb[48].mxu1 %v1027_v18 }
 0x398   :  { %v1435_v20 = vpop.f32.mrb[64].mxu0 }
 0x399   :  { %v1436_v28 = vpop.f32.mrb[65].mxu0 }
 0x39a   :  { %v1437_v32 = vadd.f32 %v1436_v28, %v1435_v20  ;;  %v1438_v29 = vpop.f32.mrb[66].mxu0 }
 0x39b   :  { %v1439_v22 = vpop.f32.mrb[67].mxu0 }
 0x39c   :  { %v1199_v35 = vadd.f32 %v1437_v32, %v2079_v21  ;;  %v1440_v23 = vadd.f32 %v1439_v22, %v1438_v29 }
 0x39e   :  { %1620 = vtanh.f32 %v1199_v35  ;;  %v1202_v24 = vadd.f32 %v1440_v23, %v2079_v21 }
 0x3a0   :  { %1622 = vtanh.f32 %v1202_v24  ;;  %v1441_v36 = vpop.f32.mrb[68].mxu0 }
 0x3a1   :  { %v1442_v37 = vpop.f32.mrb[69].mxu0 }
 0x3a2   :  { %v1443_v26 = vadd.f32 %v1442_v37, %v1441_v36  ;;  %v1444_v30 = vpop.f32.mrb[70].mxu0 }
 0x3a3   :  { %v1445_v31 = vpop.f32.mrb[71].mxu0 }
 0x3a4   :  { %v1207_v38 = vadd.f32 %v1443_v26, %v2079_v21  ;;  %v1446_v39 = vadd.f32 %v1445_v31, %v1444_v30 }
 0x3a6   :  { %1624 = vtanh.f32 %v1207_v38  ;;  %v1210_v41 = vadd.f32 %v1446_v39, %v2079_v21 }
 0x3a8   :  { %v1621_v42 = vpop.eup %1620  ;;  %1626 = vtanh.f32 %v1210_v41  ;;  %v1447_v33 = vpop.f32.mrb[72].mxu0 }
 0x3a9   :  { %v1278_v43 = vmul.f32 %v1621_v42, %v2087_v40  ;;  %v1448_v34 = vpop.f32.mrb[73].mxu0 }
 0x3aa   :  { %v1623_v44 = vpop.eup %1622  ;;  %v1449_v45 = vadd.f32 %v1448_v34, %v1447_v33  ;;  %v1450_v46 = vpop.f32.mrb[74].mxu0 }
 0x3ab   :  { %1294 = vst [vmem:[#allocation9] sm:$0xff] %v1278_v43  ;;  %v1279_v25 = vmul.f32 %v1623_v44, %v2087_v40  ;;  %v1451_v47 = vpop.f32.mrb[75].mxu0 }
 0x3ac   :  { %v1215_v48 = vadd.f32 %v1449_v45, %v2079_v21  ;;  %v1452_v27 = vadd.f32 %v1451_v47, %v1450_v46 }
 0x3ad   :  { %1295 = vst [vmem:[#allocation9 + $0x8] sm:$0xff] %v1279_v25 }
 0x3ae   :  { %1628 = vtanh.f32 %v1215_v48  ;;  %v1218_v49 = vadd.f32 %v1452_v27, %v2079_v21 }
 0x3b0   :  { %v1625_v50 = vpop.eup %1624  ;;  %1630 = vtanh.f32 %v1218_v49  ;;  %v1453_v51 = vpop.f32.mrb[32].mxu1 }
 0x3b1   :  { %v1280_v52 = vmul.f32 %v1625_v50, %v2087_v40  ;;  %v1454_v53 = vpop.f32.mrb[33].mxu1 }
 0x3b2   :  { %v1627_v54 = vpop.eup %1626  ;;  %v1455_v55 = vadd.f32 %v1454_v53, %v1453_v51  ;;  %v1456_v56 = vpop.f32.mrb[34].mxu1 }
 0x3b3   :  { %1296 = vst [vmem:[#allocation9 + $0x10] sm:$0xff] %v1280_v52  ;;  %v1281_v57 = vmul.f32 %v1627_v54, %v2087_v40  ;;  %v1457_v58 = vpop.f32.mrb[35].mxu1 }
 0x3b4   :  { %v1223_v59 = vadd.f32 %v1455_v55, %v2079_v21  ;;  %v1458_v60 = vadd.f32 %v1457_v58, %v1456_v56 }
 0x3b5   :  { %1297 = vst [vmem:[#allocation9 + $0x18] sm:$0xff] %v1281_v57 }
 0x3b6   :  { %1632 = vtanh.f32 %v1223_v59  ;;  %v1226_v61 = vadd.f32 %v1458_v60, %v2079_v21 }
 0x3b8   :  { %v1629_v62 = vpop.eup %1628  ;;  %1634 = vtanh.f32 %v1226_v61  ;;  %v1459_v63 = vpop.f32.mrb[36].mxu1 }
 0x3b9   :  { %v1282_v0 = vmul.f32 %v1629_v62, %v2087_v40  ;;  %v1460_v1 = vpop.f32.mrb[37].mxu1 }
 0x3ba   :  { %v1631_v2 = vpop.eup %1630  ;;  %v1461_v3 = vadd.f32 %v1460_v1, %v1459_v63  ;;  %v1462_v4 = vpop.f32.mrb[38].mxu1 }
 0x3bb   :  { %1298 = vst [vmem:[#allocation9 + $0x20] sm:$0xff] %v1282_v0  ;;  %v1283_v5 = vmul.f32 %v1631_v2, %v2087_v40  ;;  %v1463_v6 = vpop.f32.mrb[39].mxu1 }
 0x3bc   :  { %v1231_v7 = vadd.f32 %v1461_v3, %v2079_v21  ;;  %v1464_v8 = vadd.f32 %v1463_v6, %v1462_v4 }
 0x3bd   :  { %1299 = vst [vmem:[#allocation9 + $0x28] sm:$0xff] %v1283_v5 }
 0x3be   :  { %1636 = vtanh.f32 %v1231_v7  ;;  %v1234_v9 = vadd.f32 %v1464_v8, %v2079_v21 }
 0x3c0   :  { %v1633_v10 = vpop.eup %1632  ;;  %1638 = vtanh.f32 %v1234_v9  ;;  %v1465_v11 = vpop.f32.mrb[40].mxu1 }
 0x3c1   :  { %v1284_v12 = vmul.f32 %v1633_v10, %v2087_v40  ;;  %v1466_v13 = vpop.f32.mrb[41].mxu1 }
 0x3c2   :  { %v1635_v14 = vpop.eup %1634  ;;  %v1467_v15 = vadd.f32 %v1466_v13, %v1465_v11  ;;  %v1468_v16 = vpop.f32.mrb[42].mxu1 }
 0x3c3   :  { %1300 = vst [vmem:[#allocation9 + $0x30] sm:$0xff] %v1284_v12  ;;  %v1285_v17 = vmul.f32 %v1635_v14, %v2087_v40  ;;  %v1469_v18 = vpop.f32.mrb[43].mxu1 }
 0x3c4   :  { %v1239_v19 = vadd.f32 %v1467_v15, %v2079_v21  ;;  %v1470_v20 = vadd.f32 %v1469_v18, %v1468_v16 }
 0x3c5   :  { %1301 = vst [vmem:[#allocation9 + $0x38] sm:$0xff] %v1285_v17 }
 0x3c6   :  { %1640 = vtanh.f32 %v1239_v19  ;;  %v1242_v28 = vadd.f32 %v1470_v20, %v2079_v21 }
 0x3c8   :  { %v1637_v32 = vpop.eup %1636  ;;  %1642 = vtanh.f32 %v1242_v28  ;;  %v1471_v29 = vpop.f32.mrb[44].mxu1 }
 0x3c9   :  { %v1286_v22 = vmul.f32 %v1637_v32, %v2087_v40  ;;  %v1472_v35 = vpop.f32.mrb[45].mxu1 }
 0x3ca   :  { %v1639_v23 = vpop.eup %1638  ;;  %v1473_v24 = vadd.f32 %v1472_v35, %v1471_v29  ;;  %v1474_v36 = vpop.f32.mrb[46].mxu1 }
 0x3cb   :  { %1302 = vst [vmem:[#allocation9 + $0x40] sm:$0xff] %v1286_v22  ;;  %v1287_v37 = vmul.f32 %v1639_v23, %v2087_v40  ;;  %v1475_v26 = vpop.f32.mrb[47].mxu1 }
 0x3cc   :  { %v1247_v30 = vadd.f32 %v1473_v24, %v2079_v21  ;;  %v1476_v31 = vadd.f32 %v1475_v26, %v1474_v36 }
 0x3cd   :  { %1303 = vst [vmem:[#allocation9 + $0x48] sm:$0xff] %v1287_v37 }
 0x3ce   :  { %1644 = vtanh.f32 %v1247_v30  ;;  %v1250_v38 = vadd.f32 %v1476_v31, %v2079_v21 }
 0x3d0   :  { %v1641_v39 = vpop.eup %1640  ;;  %1646 = vtanh.f32 %v1250_v38  ;;  %v1477_v41 = vpop.f32.mrb[48].mxu1 }
 0x3d1   :  { %v1288_v42 = vmul.f32 %v1641_v39, %v2087_v40  ;;  %v1478_v33 = vpop.f32.mrb[49].mxu1 }
 0x3d2   :  { %v1643_v43 = vpop.eup %1642  ;;  %v1479_v34 = vadd.f32 %v1478_v33, %v1477_v41  ;;  %v1480_v44 = vpop.f32.mrb[50].mxu1 }
 0x3d3   :  { %1304 = vst [vmem:[#allocation9 + $0x50] sm:$0xff] %v1288_v42  ;;  %v1289_v45 = vmul.f32 %v1643_v43, %v2087_v40  ;;  %v1481_v46 = vpop.f32.mrb[51].mxu1 }
 0x3d4   :  { %v1255_v25 = vadd.f32 %v1479_v34, %v2079_v21  ;;  %v1482_v47 = vadd.f32 %v1481_v46, %v1480_v44 }
 0x3d5   :  { %1305 = vst [vmem:[#allocation9 + $0x58] sm:$0xff] %v1289_v45 }
 0x3d6   :  { %1648 = vtanh.f32 %v1255_v25  ;;  %v1258_v48 = vadd.f32 %v1482_v47, %v2079_v21 }
 0x3d8   :  { %v1645_v27 = vpop.eup %1644  ;;  %1650 = vtanh.f32 %v1258_v48 }
 0x3d9   :  { %v1290_v49 = vmul.f32 %v1645_v27, %v2087_v40 }
 0x3da   :  { %v1647_v50 = vpop.eup %1646 }
 0x3db   :  { %1306 = vst [vmem:[#allocation9 + $0x60] sm:$0xff] %v1290_v49  ;;  %v1291_v51 = vmul.f32 %v1647_v50, %v2087_v40 }
 0x3dd   :  { %1307 = vst [vmem:[#allocation9 + $0x68] sm:$0xff] %v1291_v51 }
 0x3e0   :  { %v1649_v52 = vpop.eup %1648 }
 0x3e1   :  { %v1292_v53 = vmul.f32 %v1649_v52, %v2087_v40 }
 0x3e2   :  { %v1651_v54 = vpop.eup %1650 }
 0x3e3   :  { %1308 = vst [vmem:[#allocation9 + $0x70] sm:$0xff] %v1292_v53  ;;  %v1293_v55 = vmul.f32 %v1651_v54, %v2087_v40 }
 0x3e5   :  { %1309 = vst [vmem:[#allocation9 + $0x78] sm:$0xff] %v1293_v55 }
 0x3e6   :  { %1707 = shalt.err (!%p1704_p6)
}
 0x3e7   :  { %s1708_s2 = scalar_lea.hbm %s2143_s10, 2048 }
 0x3e8   :  { %p1709_p7 = scmp.ne.s32.totalorder %s2143_s10, %s1708_s2  ;;  %p1712_p8 = scmp.lt.u32.totalorder %s1708_s2, %s2143_s10 }
 0x3ea   :  { %p1714_p9 = pnand %p1712_p8, %p1709_p7 }
 0x3ec   :  { %1717 = shalt.err (!%p1714_p9)
}
 0x3ed   :  { %1321 = dma.vmem_to_hbm [thread:$0]  %s1316_s26, 2048, %s2143_s10, [#allocation6], %s1725_s23, %s1725_s23, %s1726_s24  }
 0x3ee   :  { %1722 = dma.done.wait [#allocation6], 2048  }
 0x3ef   :  { %1723 = vsyncadd [#allocation6], 4294965248 }
 0x3f0   :  { %1325 = vsyncpa [#allocation5], 1 }
 0x3f1   :  { %1326 = vsyncpa [#allocation8], 1 }
 0x3f2   :  { %1327 = vsyncpa [#allocation6], 1 }

</bundles_post_ra>
